<compile_context>
chip_gen: v7x
topology: tpu7x:2x2x1
jax: 0.10.0
libtpu: 0.0.40
codegen_flags: <defaults>
</compile_context>

<pallas_src>
import math
import numpy as np
import jax
import jax.numpy as jnp
from jax import lax
from jax.experimental import pallas as pl
from jax.experimental.pallas import tpu as pltpu

_EPS = 1e-12


# ----------------------------------------------------------------------------
# Host-side deterministic constants (vMF KLD via Bessel-I series, no scipy).
# ----------------------------------------------------------------------------
def _log_iv(nu, x, terms=80):
    """log I_nu(x) via the standard power series (float64, deterministic)."""
    logs = []
    for m in range(terms):
        logs.append((2 * m + nu) * math.log(x / 2.0)
                    - math.lgamma(m + 1) - math.lgamma(m + nu + 1))
    logs = np.asarray(logs, dtype=np.float64)
    mx = logs.max()
    return float(mx + np.log(np.sum(np.exp(logs - mx))))


def _vmf_kld(k, d):
    """Matches vMF._vmf_kld (Guu et al. formula)."""
    li = _log_iv(d / 2.0, k)
    li1 = _log_iv(d / 2.0 + 1.0, k)
    iv = math.exp(li)
    iv1 = math.exp(li1)
    tmp = (k * ((iv1 + iv * d / (2.0 * k)) / iv - d / (2.0 * k))
           + d * math.log(k) / 2.0 - li
           - math.lgamma(d / 2.0 + 1.0) - d * math.log(2.0) / 2.0)
    return np.array([tmp], dtype=np.float32)


def _sample_weight_batch(kappa, dim, batch_sz, rng):
    """Vectorized rejection sampling of w (host-side numpy, deterministic).
    Same acceptance rule as the reference's per-row Python loop.
    Returns (batch, 2) float32: col 0 = w, col 1 = sqrt(1-w^2) (precomputed so
    the kernel never does a per-tile sqrt/clamp for the scale factor)."""
    d = dim - 1
    b = d / (np.sqrt(4.0 * kappa ** 2 + d ** 2) + 2 * kappa)
    x = (1.0 - b) / (1.0 + b)
    c = kappa * x + d * np.log(1 - x ** 2)
    out = np.empty(batch_sz, dtype=np.float64)
    todo = np.arange(batch_sz)
    while todo.size:
        n = todo.size
        z = rng.beta(d / 2.0, d / 2.0, size=n)
        w = (1.0 - (1.0 + b) * z) / (1.0 - (1.0 - b) * z)
        u = rng.uniform(low=0.0, high=1.0, size=n)
        ok = kappa * w + d * np.log(1.0 - x * w) - c >= np.log(u)
        out[todo[ok]] = w[ok]
        todo = todo[~ok]
    scale = np.sqrt(np.clip(1.0 - out ** 2, 0.0, None))
    return np.stack([out, scale], axis=1).astype(np.float32)


# ----------------------------------------------------------------------------
# Pallas kernels: fused estimate_param + sample_cell, native (B, D) layout.
# ----------------------------------------------------------------------------
def _vmf_math(mu_raw, w, scale, v):
    """Row-wise vMF math in f32.  Shapes: (tb, D), (tb, 1), (tb, 1), (tb, D)."""
    norm_sq = jnp.sum(mu_raw * mu_raw, axis=-1, keepdims=True)
    inv_norm = lax.rsqrt(jnp.maximum(norm_sq, _EPS))       # 1/||mu||
    norm = norm_sq * inv_norm                              # ||mu|| (no second sqrt)
    # Reference: redundant_norm = sum_dim1((||mu|| - 1)^2) with ||mu|| shape
    # (B, 1), i.e. the sum is over a size-1 axis -> identical to the below.
    red = (norm - 1.0) ** 2
    mu = mu_raw * inv_norm                                 # unit-norm mu
    # mu is already unit-norm; the reference's inner re-norm in sample_cell is a
    # no-op up to f32 rounding and is dropped.
    rescale = jnp.sum(mu * v, axis=-1, keepdims=True)
    ortho = v - mu * rescale
    ortho_sq = jnp.sum(ortho * ortho, axis=-1, keepdims=True)
    y = ortho * lax.rsqrt(jnp.maximum(ortho_sq, _EPS))     # unit tangent
    z = y * scale + mu * w
    return mu, red, z


def _vmf_kernel_mu(mu_ref, ws_ref, v_ref, mu_out_ref, red_ref, z_ref):
    ws = ws_ref[...].astype(jnp.float32)
    mu, red, z = _vmf_math(mu_ref[...].astype(jnp.float32),
                           ws[:, 0:1], ws[:, 1:2],
                           v_ref[...].astype(jnp.float32))
    mu_out_ref[...] = mu.astype(mu_out_ref.dtype)
    red_ref[...] = red.astype(red_ref.dtype)
    z_ref[...] = z.astype(z_ref.dtype)


def _vmf_kernel_nomu(mu_ref, ws_ref, v_ref, red_ref, z_ref):
    ws = ws_ref[...].astype(jnp.float32)
    _, red, z = _vmf_math(mu_ref[...].astype(jnp.float32),
                          ws[:, 0:1], ws[:, 1:2],
                          v_ref[...].astype(jnp.float32))
    red_ref[...] = red.astype(red_ref.dtype)
    z_ref[...] = z.astype(z_ref.dtype)


def _vmf_fused_kernel(x_ref, wp_ref, ws_ref, v_ref, mu_out_ref, red_ref, z_ref):
    # MXU projection hid_dim -> lat_dim fused with the vMF math so the latent
    # code never round-trips HBM.
    lat = jnp.dot(x_ref[...].astype(jnp.float32), wp_ref[...].astype(jnp.float32),
                  preferred_element_type=jnp.float32)
    ws = ws_ref[...].astype(jnp.float32)
    mu, red, z = _vmf_math(lat, ws[:, 0:1], ws[:, 1:2],
                           v_ref[...].astype(jnp.float32))
    mu_out_ref[...] = mu.astype(mu_out_ref.dtype)
    red_ref[...] = red.astype(red_ref.dtype)
    z_ref[...] = z.astype(z_ref.dtype)


# ----------------------------------------------------------------------------
# Tiling helpers + wrappers (no transpose / pad / cast at the boundary).
# ----------------------------------------------------------------------------
def _pick_tile(batch, block_b, min_itemsize):
    """Batch-tile rows (sublane-aligned) + grid length.  Bounded over-padding
    (< sublane*nsteps rows) and >= 2 steps when possible (v7x megacore)."""
    sub = {4: 8, 2: 16, 1: 32}.get(min_itemsize, 8)
    if batch <= sub:                       # one exact full-array block
        return batch, 1
    bpad = pl.cdiv(batch, sub) * sub
    nsteps = max(1, pl.cdiv(bpad, block_b))
    if nsteps == 1 and bpad >= 2 * sub:
        nsteps = 2                         # let "parallel" use both TCs on v7x
    tb = pl.cdiv(pl.cdiv(bpad, nsteps), sub) * sub
    return tb, pl.cdiv(batch, tb)


def _augment_ws(ws):
    """Accept (B,1) raw w or (B,2) [w, sqrt(1-w^2)]; return the latter."""
    if ws.shape[-1] == 2:
        return ws
    w = ws.astype(jnp.float32)
    return jnp.concatenate([w, jnp.sqrt(jnp.clip(1.0 - w * w, 0.0, None))], axis=-1)


def vmf_sample_pallas(latent_code, ws, v, *, block_b=8192, want_mu=True,
                      out_dtype=None):
    """latent_code: (B, D); ws: (B, 2) [w, sqrt(1-w^2)] (or (B, 1) w); v: (B, D).
    Returns (mu_normalized or None, redundant_norm (B, 1), sampled_vec (B, D))."""
    B, D = latent_code.shape
    out_dtype = out_dtype or latent_code.dtype
    ws = _augment_ws(ws)
    min_isz = min(jnp.dtype(latent_code.dtype).itemsize,
                  jnp.dtype(v.dtype).itemsize)
    tb, grid = _pick_tile(B, block_b, min_isz)

    def row_spec(n):
        return pl.BlockSpec((tb, n), lambda i: (i, 0))

    in_specs = [row_spec(D), row_spec(2), row_spec(D)]
    if want_mu:
        kernel = _vmf_kernel_mu
        out_shape = (jax.ShapeDtypeStruct((B, D), out_dtype),
                     jax.ShapeDtypeStruct((B, 1), out_dtype),
                     jax.ShapeDtypeStruct((B, D), out_dtype))
        out_specs = (row_spec(D), row_spec(1), row_spec(D))
    else:
        kernel = _vmf_kernel_nomu
        out_shape = (jax.ShapeDtypeStruct((B, 1), out_dtype),
                     jax.ShapeDtypeStruct((B, D), out_dtype))
        out_specs = (row_spec(1), row_spec(D))

    outs = pl.pallas_call(
        kernel,
        out_shape=out_shape,
        grid=(grid,),
        in_specs=in_specs,
        out_specs=out_specs,
        compiler_params=pltpu.CompilerParams(
            dimension_semantics=("parallel",),          # independent batch tiles
            vmem_limit_bytes=32 * 1024 * 1024,          # fits v5e/v6e/v7x
        ),
    )(latent_code, ws, v)

    if want_mu:
        mu, red, z = outs
    else:
        red, z = outs
        mu = None
    return mu, red, z


def vmf_encode_sample_fused_pallas(x, w_proj, ws, v, *, block_b=1024,
                                   out_dtype=None):
    """Fused encoder head: (B,H) @ (H,D) projection + vMF normalize/sample.
    TODO(synk): VMFEncoderBase.forward() is abstract in the reference; this
    assumes a bias-free linear projection — adapt if the real forward differs."""
    B, H = x.shape
    D = w_proj.shape[-1]
    out_dtype = out_dtype or x.dtype
    ws = _augment_ws(ws)
    min_isz = min(jnp.dtype(x.dtype).itemsize, jnp.dtype(v.dtype).itemsize)
    tb, grid = _pick_tile(B, block_b, min_isz)

    def row_spec(n):
        return pl.BlockSpec((tb, n), lambda i: (i, 0))

    return pl.pallas_call(
        _vmf_fused_kernel,
        out_shape=(jax.ShapeDtypeStruct((B, D), out_dtype),
                   jax.ShapeDtypeStruct((B, 1), out_dtype),
                   jax.ShapeDtypeStruct((B, D), out_dtype)),
        grid=(grid,),
        in_specs=[row_spec(H),
                  pl.BlockSpec((H, D), lambda i: (0, 0)),   # weight resident
                  row_spec(2),
                  row_spec(D)],
        out_specs=(row_spec(D), row_spec(1), row_spec(D)),
        compiler_params=pltpu.CompilerParams(
            dimension_semantics=("parallel",),
            vmem_limit_bytes=32 * 1024 * 1024,
        ),
    )(x, w_proj, ws, v)


# ----------------------------------------------------------------------------
# Module-level wrapper mirroring VMFEncoderBase / vMF (glue in plain JAX).
# ----------------------------------------------------------------------------
class VMFEncoderBasePallas:
    def __init__(self, hid_dim=1024, lat_dim=32, kappa=20):
        self.hid_dim = hid_dim
        self.lat_dim = lat_dim
        self.kappa = kappa
        self.kld = jnp.asarray(_vmf_kld(kappa, lat_dim))   # shape (1,)

    def forward(self, x):
        # TODO(synk): abstract in the reference (raises NotImplementedError);
        # see vmf_encode_sample_fused_pallas for a fused linear-head variant.
        raise NotImplementedError

    def sample_w(self, batch_sz, rng):
        return jnp.asarray(_sample_weight_batch(self.kappa, self.lat_dim,
                                                batch_sz, rng))      # (B, 2)

    def build_bow_rep(self, lat_code, ws, v, want_mu=True):
        mu, redundant_norm, z = vmf_sample_pallas(lat_code, ws, v, want_mu=want_mu)
        tup = {
            "kappa": self.kappa,
            # Reference parity: vMF.estimate_param stores ones_like(mu) here.
            # Kept as a lazy XLA broadcast; it never touches the Pallas kernel.
            "norm": jnp.ones_like(lat_code),
            "redundant_norm": redundant_norm,
            "mu": mu,
        }
        kld = jnp.broadcast_to(self.kld, (lat_code.shape[0],))
        return tup, kld, z

    def sample(self, lat_code, ws, v):
        # Reference sample() returns (z[:, None, :], (mu, mu)) where mu is the
        # *pre-normalization* encoder mean, so the normalized-mu output stream
        # is skipped here (want_mu=False) to save one (B, D) HBM write.
        tup, kld, z = self.build_bow_rep(lat_code, ws, v, want_mu=False)
        return z[:, None, :], (lat_code, lat_code), kld


if __name__ == "__main__":
    B, NZ, H = 13, 32, 256        # small shapes; B=13 exercises the masked edge tile
    enc = VMFEncoderBasePallas(hid_dim=H, lat_dim=NZ, kappa=20)

    key = jax.random.PRNGKey(0)
    k_mu, k_v, k_x, k_w = jax.random.split(key, 4)
    latent_code = jax.random.normal(k_mu, (B, NZ), dtype=jnp.float32)   # encoder "mean"
    v_noise = jax.random.normal(k_v, (B, NZ), dtype=jnp.float32)        # tangent noise

    # host-side (vectorized) rejection sampling of w — deterministic
    rng = np.random.RandomState(0)
    ws = enc.sample_w(B, rng)                                           # (B, 2)

    # --- main path: build_bow_rep (with mu) and sample (without mu output) ---
    tup, kld, z = enc.build_bow_rep(latent_code, ws, v_noise, want_mu=True)
    z3, (mu_in, _), kld2 = enc.sample(latent_code, ws, v_noise)
    jax.block_until_ready((tup["mu"], tup["redundant_norm"], kld, z, z3))

    assert z.shape == (B, NZ) and z3.shape == (B, 1, NZ)
    assert tup["mu"].shape == (B, NZ) and tup["redundant_norm"].shape == (B, 1)
    assert kld.shape == (B,) and np.all(np.isfinite(np.asarray(kld)))

    mu_np = np.asarray(tup["mu"], dtype=np.float64)
    red_np = np.asarray(tup["redundant_norm"], dtype=np.float64)
    z_np = np.asarray(z, dtype=np.float64)
    assert np.allclose(np.linalg.norm(z_np, axis=1), 1.0, atol=1e-3)    # on the sphere
    assert np.allclose(np.linalg.norm(mu_np, axis=1), 1.0, atol=1e-3)
    assert np.allclose(np.asarray(z3[:, 0, :]), np.asarray(z), atol=1e-6)

    # numerical cross-check against a float64 numpy reference of the same math
    lat64 = np.asarray(latent_code, dtype=np.float64)
    v64 = np.asarray(v_noise, dtype=np.float64)
    w64 = np.asarray(ws, dtype=np.float64)[:, 0:1]
    s64 = np.asarray(ws, dtype=np.float64)[:, 1:2]
    norm_ref = np.linalg.norm(lat64, axis=1, keepdims=True)
    mu_ref = lat64 / norm_ref
    red_ref = (norm_ref - 1.0) ** 2
    resc = np.sum(mu_ref * v64, axis=1, keepdims=True)
    orth = v64 - mu_ref * resc
    y_ref = orth / np.linalg.norm(orth, axis=1, keepdims=True)
    z_ref = y_ref * s64 + mu_ref * w64
    assert np.allclose(mu_np, mu_ref, atol=5e-4)
    assert np.allclose(red_np, red_ref, rtol=1e-4, atol=1e-3)
    assert np.allclose(z_np, z_ref, atol=5e-4)

    # --- optional fused path: hid->lat projection + vMF math in one kernel ---
    w_proj = jax.random.normal(k_w, (H, NZ), dtype=jnp.float32) / np.float32(np.sqrt(H))
    x_hid = jax.random.normal(k_x, (B, H), dtype=jnp.float32)
    mu_f, red_f, z_f = vmf_encode_sample_fused_pallas(x_hid, w_proj, ws, v_noise)
    jax.block_until_ready((mu_f, red_f, z_f))

    assert mu_f.shape == (B, NZ) and red_f.shape == (B, 1) and z_f.shape == (B, NZ)
    zf64 = np.asarray(z_f, dtype=np.float64)
    assert np.all(np.isfinite(zf64)) and np.all(np.isfinite(np.asarray(red_f)))
    assert np.allclose(np.linalg.norm(zf64, axis=1), 1.0, atol=1e-3)
    lat_f64 = np.asarray(x_hid, dtype=np.float64) @ np.asarray(w_proj, dtype=np.float64)
    n_f = np.linalg.norm(lat_f64, axis=1, keepdims=True)
    mu_fr = lat_f64 / n_f
    resc_f = np.sum(mu_fr * v64, axis=1, keepdims=True)
    orth_f = v64 - mu_fr * resc_f
    y_fr = orth_f / np.linalg.norm(orth_f, axis=1, keepdims=True)
    z_fr = y_fr * s64 + mu_fr * w64
    assert np.allclose(zf64, z_fr, atol=2e-2)   # loose: MXU reduced-precision f32 matmul

    print("KERNEL_OK")
</pallas_src>

<mosaic_0001>
module attributes {stable_mosaic.version = 11 : i64} {
  func.func @_vmf_kernel_mu(%arg0: i32, %arg1: memref<8x32xf32, #tpu.memory_space<vmem>>, %arg2: memref<8x2xf32, #tpu.memory_space<vmem>>, %arg3: memref<8x32xf32, #tpu.memory_space<vmem>>, %arg4: memref<8x32xf32, #tpu.memory_space<vmem>>, %arg5: memref<8x1xf32, #tpu.memory_space<vmem>>, %arg6: memref<8x32xf32, #tpu.memory_space<vmem>>) attributes {dimension_semantics = [#tpu.dimension_semantics<parallel>], iteration_bounds = array<i64: 2>, scalar_prefetch = 0 : i64, scratch_operands = 0 : i64, tpu.core_type = #tpu.core_type<tc>, window_params = [{transform_indices = @transform_0, window_bounds = array<i64: 8, 32>}, {transform_indices = @transform_1, window_bounds = array<i64: 8, 2>}, {transform_indices = @transform_2, window_bounds = array<i64: 8, 32>}, {transform_indices = @transform_3, window_bounds = array<i64: 8, 32>}, {transform_indices = @transform_4, window_bounds = array<i64: 8, 1>}, {transform_indices = @transform_5, window_bounds = array<i64: 8, 32>}]} {
    %c0 = arith.constant 0 : index
    %c0_0 = arith.constant 0 : index
    %0 = vector.load %arg2[%c0, %c0_0] : memref<8x2xf32, #tpu.memory_space<vmem>>, vector<8x2xf32>
    %c0_1 = arith.constant 0 : index
    %c0_2 = arith.constant 0 : index
    %1 = vector.load %arg1[%c0_1, %c0_2] : memref<8x32xf32, #tpu.memory_space<vmem>>, vector<8x32xf32>
    %2 = vector.extract_strided_slice %0 {offsets = [0, 0], sizes = [8, 1], strides = [1, 1]} : vector<8x2xf32> to vector<8x1xf32>
    %3 = vector.extract_strided_slice %0 {offsets = [0, 1], sizes = [8, 1], strides = [1, 1]} : vector<8x2xf32> to vector<8x1xf32>
    %c0_3 = arith.constant 0 : index
    %c0_4 = arith.constant 0 : index
    %4 = vector.load %arg3[%c0_3, %c0_4] : memref<8x32xf32, #tpu.memory_space<vmem>>, vector<8x32xf32>
    %5 = arith.mulf %1, %1 : vector<8x32xf32>
    %cst = arith.constant dense<0.000000e+00> : vector<8xf32>
    %6 = vector.multi_reduction <add>, %5, %cst [1] : vector<8x32xf32> to vector<8xf32>
    %7 = vector.shape_cast %6 : vector<8xf32> to vector<8x1xf32>
    %cst_5 = arith.constant 9.99999996E-13 : f32
    %8 = vector.broadcast %cst_5 : f32 to vector<8x1xf32>
    %9 = arith.maximumf %7, %8 : vector<8x1xf32>
    %10 = math.rsqrt %9 : vector<8x1xf32>
    %11 = arith.mulf %7, %10 : vector<8x1xf32>
    %cst_6 = arith.constant 1.000000e+00 : f32
    %12 = vector.broadcast %cst_6 : f32 to vector<8x1xf32>
    %13 = arith.subf %11, %12 : vector<8x1xf32>
    %14 = arith.mulf %13, %13 : vector<8x1xf32>
    %15 = vector.broadcast %10 : vector<8x1xf32> to vector<8x32xf32>
    %16 = arith.mulf %1, %15 : vector<8x32xf32>
    %17 = arith.mulf %16, %4 : vector<8x32xf32>
    %cst_7 = arith.constant dense<0.000000e+00> : vector<8xf32>
    %18 = vector.multi_reduction <add>, %17, %cst_7 [1] : vector<8x32xf32> to vector<8xf32>
    %19 = vector.shape_cast %18 : vector<8xf32> to vector<8x1xf32>
    %20 = vector.broadcast %19 : vector<8x1xf32> to vector<8x32xf32>
    %21 = arith.mulf %16, %20 : vector<8x32xf32>
    %22 = arith.subf %4, %21 : vector<8x32xf32>
    %23 = arith.mulf %22, %22 : vector<8x32xf32>
    %cst_8 = arith.constant dense<0.000000e+00> : vector<8xf32>
    %24 = vector.multi_reduction <add>, %23, %cst_8 [1] : vector<8x32xf32> to vector<8xf32>
    %25 = vector.shape_cast %24 : vector<8xf32> to vector<8x1xf32>
    %cst_9 = arith.constant 9.99999996E-13 : f32
    %26 = vector.broadcast %cst_9 : f32 to vector<8x1xf32>
    %27 = arith.maximumf %25, %26 : vector<8x1xf32>
    %28 = math.rsqrt %27 : vector<8x1xf32>
    %29 = vector.broadcast %28 : vector<8x1xf32> to vector<8x32xf32>
    %30 = arith.mulf %22, %29 : vector<8x32xf32>
    %31 = vector.broadcast %3 : vector<8x1xf32> to vector<8x32xf32>
    %32 = arith.mulf %30, %31 : vector<8x32xf32>
    %33 = vector.broadcast %2 : vector<8x1xf32> to vector<8x32xf32>
    %34 = arith.mulf %16, %33 : vector<8x32xf32>
    %35 = arith.addf %32, %34 : vector<8x32xf32>
    %c0_10 = arith.constant 0 : index
    %c0_11 = arith.constant 0 : index
    %36 = vector.load %arg4[%c0_10, %c0_11] : memref<8x32xf32, #tpu.memory_space<vmem>>, vector<8x32xf32>
    tpu.vector_store %arg4[%c0_10, %c0_11], %16 {strides = array<i32>} : memref<8x32xf32, #tpu.memory_space<vmem>>, vector<8x32xf32>,
    %c0_12 = arith.constant 0 : index
    %c0_13 = arith.constant 0 : index
    %37 = vector.load %arg5[%c0_12, %c0_13] : memref<8x1xf32, #tpu.memory_space<vmem>>, vector<8x1xf32>
    tpu.vector_store %arg5[%c0_12, %c0_13], %14 {strides = array<i32>} : memref<8x1xf32, #tpu.memory_space<vmem>>, vector<8x1xf32>,
    %c0_14 = arith.constant 0 : index
    %c0_15 = arith.constant 0 : index
    %38 = vector.load %arg6[%c0_14, %c0_15] : memref<8x32xf32, #tpu.memory_space<vmem>>, vector<8x32xf32>
    tpu.vector_store %arg6[%c0_14, %c0_15], %35 {strides = array<i32>} : memref<8x32xf32, #tpu.memory_space<vmem>>, vector<8x32xf32>,
    return
  }
  func.func @transform_0(%arg0: i32) -> (i32, i32) {
    %c0_i32 = arith.constant 0 : i32
    %c0_i32_0 = arith.constant 0 : i32
    return %arg0, %c0_i32 : i32, i32
  }
  func.func @transform_1(%arg0: i32) -> (i32, i32) {
    %c0_i32 = arith.constant 0 : i32
    %c0_i32_0 = arith.constant 0 : i32
    return %arg0, %c0_i32 : i32, i32
  }
  func.func @transform_2(%arg0: i32) -> (i32, i32) {
    %c0_i32 = arith.constant 0 : i32
    %c0_i32_0 = arith.constant 0 : i32
    return %arg0, %c0_i32 : i32, i32
  }
  func.func @transform_3(%arg0: i32) -> (i32, i32) {
    %c0_i32 = arith.constant 0 : i32
    %c0_i32_0 = arith.constant 0 : i32
    return %arg0, %c0_i32 : i32, i32
  }
  func.func @transform_4(%arg0: i32) -> (i32, i32) {
    %c0_i32 = arith.constant 0 : i32
    %c0_i32_0 = arith.constant 0 : i32
    return %arg0, %c0_i32 : i32, i32
  }
  func.func @transform_5(%arg0: i32) -> (i32, i32) {
    %c0_i32 = arith.constant 0 : i32
    %c0_i32_0 = arith.constant 0 : i32
    return %arg0, %c0_i32 : i32, i32
  }
}

</mosaic_0001>

<bundles_post_ra>
// kernel: tpu_custom_call.1
= control target key start
LH: loop header
LB: loop body
LE: loop exit
PB: predicated region body
PF: predicated region fallthrough
CT: control target
= control target key end

     0   :  { %11 = vsyncpa [#allocation3], 0  ;;  %s985_s0 = inlined_call_operand.vmem [shape: f32[13,32], index: 0, kind: input, shape index: {}]   ;;  %s986_s1 = inlined_call_operand.vmem [shape: f32[13,2], index: 1, kind: input, shape index: {}]   ;;  %s987_s2 = inlined_call_operand.hbm [shape: f32[13,32], index: 2, kind: input, shape index: {}]   ;;  %s988_s3 = inlined_call_operand.hbm [shape: f32[13,32], index: 3, kind: output, shape index: {0}]   ;;  %s989_s4 = inlined_call_operand.vmem [shape: f32[13,1], index: 4, kind: output, shape index: {1}]   ;;  %s990_s5 = inlined_call_operand.hbm [shape: f32[13,32], index: 5, kind: output, shape index: {2}]  }
   0x1   :  { %13 = vsyncpa [#allocation3 + $0x1], 0 }
   0x2   :  { %14 = vsyncpa [#allocation4], 0 }
   0x3   :  { %16 = vsyncpa [#allocation4 + $0x1], 0 }
   0x4   :  { %17 = vsyncpa [#allocation7], 0 }
   0x5   :  { %19 = vsyncpa [#allocation7 + $0x1], 0  ;;  %s770_s18 = smov 0   ;;  %s772_s19 = smov 0  }
   0x6   :  { %s774_s20 = smov 0   ;;  %s776_s21 = smov 0  }
   0x7 LB: > { %s791_s22 = sadd.s32 4294967295, %s733_s21   ;;  %s527_s23 = sadd.s32 4294967294, %s733_s21   ;;  %s733_s21 = sphi %s776_s21, %s1005_s21   ;;  %s729_s20 = sphi %s774_s20, %s1004_s20   ;;  %s725_s19 = sphi %s772_s19, %s1003_s19   ;;  %s721_s18 = sphi %s770_s18, %s1002_s18  }
   0x8   : > { %s795_s24 = sadd.s32 1, %s733_s21   ;;  %s84_s25 = sadd.s32 1, %s729_s20 }
   0x9   : > { %s81_s26 = ssub.s32 %s733_s21, %s795_s24  ;;  %p91_p0 = scmp.ne.s32.totalorder %s729_s20, %s725_s19 }
   0xa   : > { %p82_p1 = scmp.eq.s32.totalorder %s81_s26, 0  ;;  %p92_p2 = scmp.eq.s32.totalorder %s733_s21, 0 }
   0xb   : > { %p97_p3 = scmp.ne.s32.totalorder %s725_s19, %s721_s18  ;;  %p98_p4 = scmp.eq.s32.totalorder %s791_s22, 0 }
   0xc   : > { %s807_s27 = scalar_select %p82_p1, %s729_s20, %s84_s25  }
   0xd   : > { %p809_p5 = por %p92_p2, %p91_p0  ;;  %p813_p6 = por %p98_p4, %p97_p3 }
   0xe   : > { %p121_p7 = scmp.eq.s32.totalorder %s791_s22, 1  ;;  %p127_p8 = scmp.eq.s32.totalorder %s527_s23, 1 }
   0xf   : > { %p563_p10 = scmp.lt.s32.totalorder %s733_s21, 2  ;;  %s213_s7 = sand.u32 1, %s729_s20  }
  0x10   : > { %p820_p11 = por %p121_p7, %p91_p0  ;;  %p824_p12 = por %p127_p8, %p97_p3 }
  0x11   : > { %s531_s8 = sshll.u32 %s733_s21, 7  ;;  %s530_s9 = sshll.u32 %s213_s7, 3 }
  0x12   : > { %s994_s30 = scalar_select %p820_p11, 1, 0 }
  0x13   : > { %s995_s6 = scalar_select %p824_p12, 1, 0 }
  0x14   : > { %s833_s12 = scalar_lea.hbm %s987_s2, %s531_s8  ;;  %s217_s13 = scalar_lea.vmem [#allocation2], %s530_s9 }
  0x15   : > { %s224_s14 = sshll.u32 %s217_s13, 4  ;;  %p837_p13 = pnand %p563_p10, %p809_p5  ;;  %s841_s14 = int_to_ptr.vmem [resolvable:$true] %s224_s14 }
  0x16   : > { %s214_s16 = scalar_lea.sflag [#allocation3], %s213_s7  ;;  %s605_s17 = scalar_lea.hbm %s833_s12, 128 }
  0x17   : > { %p606_p2 = scmp.ne.s32.totalorder %s833_s12, %s605_s17  ;;  %p607_p3 = pneg %p837_p13 }
  0x18   : > { %s610_s26 = scalar_lea.hbm %s987_s2, 256  ;;  %p611_p5 = scmp.lt.u32.totalorder %s833_s12, %s987_s2 }
  0x19   : > { %p608_p4 = pnand %p607_p3, %p606_p2  ;;  %p612_p8 = scmp.lt.u32.totalorder %s610_s26, %s605_s17 }
  0x1a   : > { %p614_p9 = scmp.lt.u32.totalorder %s605_s17, %s833_s12 }
  0x1b   : > { %p609_p7 = pneg %p608_p4  ;;  %p613_p10 = por %p612_p8, %p611_p5 }
  0x1d   : > { %p615_p0 = por %p614_p9, %p613_p10 }
  0x1f   : > { %p616_p1 = pnand %p615_p0, %p609_p7 }
  0x21   : > { %619 = shalt.err (!%p616_p1)
}
  0x22   : > { %s620_s7 = scalar_lea.vmem %s841_s14, 128  ;;  %s735_s9 = smov [#allocation2]  }
  0x23   : > { %p621_p2 = scmp.ne.s32.totalorder %s841_s14, %s620_s7  ;;  %s625_s10 = sshll.u32 %s735_s9, 4  ;;  %s626_s10 = int_to_ptr.vmem [resolvable:$false] %s625_s10 }
  0x24   : > { %s627_s11 = scalar_lea.vmem %s626_s10, 256  ;;  %p628_p11 = scmp.lt.s32.totalorder %s841_s14, %s626_s10 }
  0x25   : > { %p623_p4 = pnand %p621_p2, %p607_p3  ;;  %p629_p5 = scmp.lt.s32.totalorder %s627_s11, %s620_s7 }
  0x27   : > { %p624_p12 = pneg %p623_p4  ;;  %p630_p8 = por %p629_p5, %p628_p11 }
  0x29   : > { %p631_p9 = pnand %p630_p8, %p624_p12 }
  0x2b   : > { %634 = shalt.err (!%p631_p9)
}
  0x2c   : > { %555 = dma.hbm_to_vmem [thread:$0]  (!%p837_p13), %s833_s12, 128, %s841_s14, %s214_s16  }
  0x2d   : > { %p997_p0 = scmp.lt.s32.totalorder %s733_s21, 3  ;;  %p998_p1 = scmp.ge.s32.totalorder %s733_s21, 1 }
  0x2f   : > { %p230_p3 = pnand %p998_p1, %p997_p0 }
  0x30   : > { %s875_s13 = sand.u32 (!%p230_p3), 1, %s725_s19  }
  0x31   : > { %233 = sbr.rel (%p230_p3) target bundleno = 551 (0x227), region = 32  ;;  %s878_s17 = sshll.u32 (!%p230_p3), %s875_s13, 3 }
  0x32   : > { %s236_s23 = scalar_lea.sflag (!%p230_p3), [#allocation3], %s875_s13  ;;  %s239_s15 = scalar_lea.vmem (!%p230_p3), [#allocation2], %s878_s17 }
  0x38   : > { %708 = dma.done.wait (%p813_p6), %s236_s23, 128  }
  0x39   : > { %710 = vsyncadd (%p813_p6), %s236_s23, 4294967168  ;;  %p283_p11 = scmp.lt.s32.totalorder %s791_s22, 1  ;;  %vm299_vm0 = vcmask 261120   ;;  %v736_v3 = vmov 0   ;;  %v297_v7 = vld [vmem:[%s239_s15] sm:$0xff]  ;;  %s269_s29 = scalar_lea.vmem [#allocation5], %s878_s17 }
  0x3a   : > { %600 = vset.pattern.permute.xlu0 %v736_v3  ;;  %vm335_vm1 = vcmask 7168   ;;  %v737_v15 = vmov 1   ;;  %s542_s23 = sshll.u32 %s791_s22, 7  ;;  %s361_s16 = sshll.u32 %s269_s29, 4  ;;  %s362_s16 = int_to_ptr.vmem [resolvable:$true] %s361_s16 }
  0x3b   : > { %s284_s12 = scalar_select %p283_p11, %s791_s22, 1  ;;  %599 = vset.pattern.permute.xlu1 %v737_v15 }
  0x3c   : > { %s339_s25 = scalar_lea.sflag [#allocation4], %s875_s13  ;;  %p999_p12 = scmp.ne.s32.totalorder %s994_s30, 0 }
  0x3d   : > { %s536_s14 = sshll.u32 %s284_s12, 3  ;;  %s738_s28 = smov [#allocation5]  }
  0x3e   : > { %s286_s26 = scalar_lea.vmem %s985_s0, %s536_s14  ;;  %s294_s7 = scalar_lea.vmem %s989_s4, %s536_s14 }
  0x3f   : > { %v296_v0 = vld [vmem:[%s286_s26] sm:$0xff]  ;;  %s290_s11 = scalar_lea.vmem %s986_s1, %s536_s14  ;;  %s913_s14 = scalar_lea.hbm %s988_s3, %s542_s23 }
  0x40   : > { %v298_v1 = vmul.f32 %v296_v0, %v296_v0  ;;  %v295_v14 = vld [vmem:[%s290_s11] sm:$0xff]  ;;  %s635_s26 = scalar_lea.vmem %s362_s16, 128  ;;  %s639_s8 = sshll.u32 %s738_s28, 4  ;;  %s640_s8 = int_to_ptr.vmem [resolvable:$false] %s639_s8 }
  0x41   : > { %p636_p6 = scmp.ne.s32.totalorder %s362_s16, %s635_s26  ;;  %p642_p10 = scmp.lt.s32.totalorder %s362_s16, %s640_s8 }
  0x42   : > { %v300_v2 = vsel %vm299_vm0, %v298_v1, 0.0 }
  0x43   : > { %301 = vadd.xlane.f32.xlu0 %v300_v2  ;;  %p637_p13 = pnand %p636_p6, %p999_p12 }
  0x45   : > { %p638_p7 = pneg %p637_p13 }
  0xd0   : > { %v302_v4 = vpop.xlane.xlu0 %301 }
  0xd1   : > { %v303_v5 = vmax.f32 %v302_v4, 1e-12 }
  0xd3   : > { %601 = vrsqrt.f32 %v303_v5 }
  0xdd   : > { %v602_v6 = vpop.eup %601 }
  0xde   : > { %v305_v8 = vmul.f32 %v602_v6, %v302_v4  ;;  %v892_v9 = vmul.f32 %v602_v6, %v296_v0 }
  0xe0   : > { %v539_v10 = vadd.f32 -1.0, %v305_v8  ;;  %v309_v11 = vmul.f32 %v892_v9, %v297_v7  ;;  %334 = vst.msk [vmem:[%s269_s29] sm:$0xff] %vm299_vm0, %v892_v9 }
  0xe2   : > { %v307_v12 = vmul.f32 %v539_v10, %v539_v10  ;;  %v310_v13 = vsel %vm299_vm0, %v309_v11, 0.0 }
  0xe3   : > { %311 = vadd.xlane.f32.xlu0 %v310_v13 }
  0xe4   : > { %336 = vst.msk [vmem:[%s294_s7] sm:$0xff] %vm335_vm1, %v307_v12  ;;  %s641_s7 = scalar_lea.vmem %s640_s8, 256 }
  0xe5   : > { %p643_p2 = scmp.lt.s32.totalorder %s641_s7, %s635_s26 }
  0xe7   : > { %p644_p4 = por %p643_p2, %p642_p10 }
  0xe9   : > { %p645_p5 = pnand %p644_p4, %p638_p7 }
  0xf9   : > { %329 = vperm.xlu0 %600, %v295_v14  }
 0x170   : > { %v312_v16 = vpop.xlane.xlu0 %311 }
 0x171   : > { %v313_v17 = vmul.f32 %v312_v16, %v892_v9 }
 0x173   : > { %v314_v18 = vsub.f32 %v297_v7, %v313_v17 }
 0x175   : > { %v315_v19 = vmul.f32 %v314_v18, %v314_v18 }
 0x177   : > { %v316_v20 = vsel %vm299_vm0, %v315_v19, 0.0 }
 0x178   : > { %317 = vadd.xlane.f32.xlu1 %v316_v20 }
 0x189   : > { %324 = vperm.xlu1 %599, %v295_v14  }
 0x18a   : > { %648 = shalt.err (!%p645_p5)
}
 0x18b   : > { %s649_s29 = scalar_lea.hbm %s913_s14, 128  ;;  %s653_s11 = scalar_lea.hbm %s988_s3, 256 }
 0x18c   : > { %p650_p8 = scmp.ne.s32.totalorder %s913_s14, %s649_s29  ;;  %p654_p1 = scmp.lt.u32.totalorder %s913_s14, %s988_s3 }
 0x18d   : > { %p655_p3 = scmp.lt.u32.totalorder %s653_s11, %s649_s29  ;;  %p657_p6 = scmp.lt.u32.totalorder %s649_s29, %s913_s14 }
 0x18e   : > { %p651_p9 = pnand %p650_p8, %p999_p12 }
 0x18f   : > { %p656_p11 = por %p655_p3, %p654_p1 }
 0x190   : > { %p652_p0 = pneg %p651_p9 }
 0x191   : > { %p658_p13 = por %p657_p6, %p656_p11 }
 0x193   : > { %p659_p7 = pnand %p658_p13, %p652_p0 }
 0x195   : > { %662 = shalt.err (!%p659_p7)
}
 0x196   : > { %548 = dma.vmem_to_hbm [thread:$0]  (%p999_p12), %s362_s16, 128, %s913_s14, %s339_s25   ;;  %v330_v24 = vpop.permute.xlu0 %329 }
 0x197   : > { %s282_s26 = scalar_lea.vmem [#allocation6], %s878_s17  ;;  %v332_v27 = vmul.f32 %v330_v24, %v892_v9  ;;  %s940_s14 = scalar_lea.hbm %s990_s5, %s542_s23 }
 0x198   : > { %s377_s28 = sshll.u32 %s282_s26, 4  ;;  %s348_s16 = scalar_lea.sflag [#allocation7], %s875_s13  ;;  %s942_s28 = int_to_ptr.vmem [resolvable:$true] %s377_s28 }
 0x199   : > { %s663_s17 = scalar_lea.vmem %s942_s28, 128  ;;  %s739_s25 = smov [#allocation6]  }
 0x19a   : > { %p664_p10 = scmp.ne.s32.totalorder %s942_s28, %s663_s17  ;;  %s667_s22 = sshll.u32 %s739_s25, 4  ;;  %s668_s22 = int_to_ptr.vmem [resolvable:$false] %s667_s22 }
 0x19b   : > { %s669_s29 = scalar_lea.vmem %s668_s22, 256  ;;  %p670_p5 = scmp.lt.s32.totalorder %s942_s28, %s668_s22 }
 0x19c   : > { %p665_p2 = pnand %p664_p10, %p999_p12  ;;  %p671_p8 = scmp.lt.s32.totalorder %s669_s29, %s663_s17 }
 0x19e   : > { %p666_p4 = pneg %p665_p2  ;;  %p672_p9 = por %p671_p8, %p670_p5 }
 0x1a0   : > { %p673_p0 = pnand %p672_p9, %p666_p4 }
 0x205   : > { %v318_v21 = vpop.xlane.xlu1 %317 }
 0x206   : > { %v319_v22 = vmax.f32 %v318_v21, 1e-12 }
 0x208   : > { %603 = vrsqrt.f32 %v319_v22 }
 0x209   : > { %v325_v25 = vpop.permute.xlu1 %324 }
 0x212   : > { %v604_v23 = vpop.eup %603 }
 0x213   : > { %v321_v26 = vmul.f32 %v604_v23, %v314_v18 }
 0x215   : > { %v327_v28 = vmul.f32 %v325_v25, %v321_v26 }
 0x217   : > { %v333_v29 = vadd.f32 %v332_v27, %v327_v28 }
 0x219   : > { %337 = vst.msk [vmem:[%s282_s26] sm:$0xff] %vm299_vm0, %v333_v29 }
 0x21a   : > { %676 = shalt.err (!%p673_p0)
}
 0x21b   : > { %s677_s13 = scalar_lea.hbm %s940_s14, 128  ;;  %s681_s10 = scalar_lea.hbm %s990_s5, 256 }
 0x21c   : > { %p678_p1 = scmp.ne.s32.totalorder %s940_s14, %s677_s13  ;;  %p682_p6 = scmp.lt.u32.totalorder %s940_s14, %s990_s5 }
 0x21d   : > { %p683_p13 = scmp.lt.u32.totalorder %s681_s10, %s677_s13  ;;  %p685_p10 = scmp.lt.u32.totalorder %s677_s13, %s940_s14 }
 0x21e   : > { %p679_p3 = pnand %p678_p1, %p999_p12 }
 0x21f   : > { %p684_p7 = por %p683_p13, %p682_p6 }
 0x220   : > { %p680_p11 = pneg %p679_p3 }
 0x221   : > { %p686_p2 = por %p685_p10, %p684_p7 }
 0x223   : > { %p687_p4 = pnand %p686_p2, %p680_p11 }
 0x225   : > { %690 = shalt.err (!%p687_p4)
}
 0x226   : > { %549 = dma.vmem_to_hbm [thread:$0]  (%p999_p12), %s942_s28, 128, %s940_s14, %s348_s16  }
 0x227 PF: > { %s389_s12 = sand.u32 1, %s721_s18   ;;  %p1000_p5 = scmp.ne.s32.totalorder %s995_s6, 0 }
 0x228   : > { %p1001_p8 = scmp.ge.s32.totalorder %s733_s21, 2  ;;  %s390_s26 = scalar_lea.sflag [#allocation4], %s389_s12 }
 0x22a   : > { %p557_p9 = pnand %p1001_p8, %p1000_p5 }
 0x22c   : > { %712 = dma.done.wait (!%p557_p9), %s390_s26, 128  }
 0x22d   : > { %714 = vsyncadd (!%p557_p9), %s390_s26, 4294967168  ;;  %s406_s8 = scalar_lea.sflag [#allocation7], %s389_s12 }
 0x22e   : > { %716 = dma.done.wait (!%p557_p9), %s406_s8, 128  }
 0x22f   : > { %718 = vsyncadd (!%p557_p9), %s406_s8, 4294967168  ;;  %p22_p12 = scmp.ge.s32.totalorder %s795_s24, 4   ;;  %s1002_s18 = smov %s725_s19 }
 0x230   : > { %s1003_s19 = smov %s729_s20  ;;  %s1004_s20 = smov %s807_s27 }
 0x231   : > { %s1005_s21 = smov %s795_s24  ;;  %24 = sbr.rel (!%p22_p12) target bundleno = 7 (0x7), region = 112 }
 0x238   :  { %411 = vsyncpa [#allocation3], 1 }
 0x239   :  { %413 = vsyncpa [#allocation3 + $0x1], 1 }
 0x23a   :  { %414 = vsyncpa [#allocation4], 1 }
 0x23b   :  { %416 = vsyncpa [#allocation4 + $0x1], 1 }
 0x23c   :  { %417 = vsyncpa [#allocation7], 1 }
 0x23d   :  { %419 = vsyncpa [#allocation7 + $0x1], 1 }

</bundles_post_ra>
